<compile_context>
chip_gen: v7x
topology: tpu7x:2x2x1
jax: 0.10.0
libtpu: 0.0.40
codegen_flags: <defaults>
</compile_context>

<pallas_src>
import math
import functools

import jax
import jax.numpy as jnp
from jax import lax
from jax.experimental import pallas as pl
from jax.experimental.pallas import tpu as pltpu


def _pick_tile(dim, preferred, quantum):
    """Largest multiple of `quantum` that is <= preferred and divides `dim`;
    falls back to the full dim (always legal as a block size)."""
    t = (preferred // quantum) * quantum
    while t >= quantum:
        if dim % t == 0:
            return t
        t -= quantum
    return dim


# ----------------------------- Linear kernel ---------------------------------
def _linear_kernel(x_ref, w_ref, b_ref, o_ref, acc_ref):
    k = pl.program_id(2)

    @pl.when(k == 0)
    def _():
        acc_ref[...] = jnp.zeros_like(acc_ref)

    acc_ref[...] += jnp.dot(x_ref[...], w_ref[...],
                            preferred_element_type=jnp.float32)

    @pl.when(k == pl.num_programs(2) - 1)
    def _():
        o_ref[...] = (acc_ref[...] + b_ref[...].astype(jnp.float32)
                      ).astype(o_ref.dtype)


def linear(x2d, w, b, *, tm=256, tn=256, tk=512):
    """x2d: (M, d_in), w: (d_in, d_out) [= PyTorch weight.T], b: (d_out,)."""
    M, K = x2d.shape
    N = w.shape[1]
    tm = _pick_tile(M, tm, 8)      # sublane quantum
    tn = _pick_tile(N, tn, 128)    # lane quantum
    tk = _pick_tile(K, tk, 128)
    grid = (M // tm, N // tn, K // tk)
    itemsize = jnp.dtype(x2d.dtype).itemsize
    bytes_accessed = itemsize * (M * K + K * N + N + M * N)
    return pl.pallas_call(
        _linear_kernel,
        out_shape=jax.ShapeDtypeStruct((M, N), x2d.dtype),
        grid_spec=pltpu.PrefetchScalarGridSpec(
            num_scalar_prefetch=0,
            grid=grid,
            in_specs=[
                pl.BlockSpec((tm, tk), lambda i, j, k: (i, k)),
                pl.BlockSpec((tk, tn), lambda i, j, k: (k, j)),
                pl.BlockSpec((1, tn), lambda i, j, k: (0, j)),
            ],
            out_specs=pl.BlockSpec((tm, tn), lambda i, j, k: (i, j)),
            scratch_shapes=[pltpu.VMEM((tm, tn), jnp.float32)],
        ),
        compiler_params=pltpu.CompilerParams(
            dimension_semantics=("parallel", "parallel", "arbitrary")),
        cost_estimate=pl.CostEstimate(
            flops=2 * M * N * K, transcendentals=0,
            bytes_accessed=bytes_accessed),
    )(x2d, w, b.reshape(1, N))


# --------------------------- Attention kernel ---------------------------------
def _attn_kernel(q_ref, kv_ref, o_ref, *, n_heads, d_head):
    # q_ref:  (1, tq,  D)   -- Q already scaled by 1/sqrt(d_head) (folded in wq)
    # kv_ref: (1, Lkv, 2*D) -- [K | V] fused projection output
    # o_ref:  (1, tq,  D)   -- lane-dense output block
    D = n_heads * d_head
    q = q_ref[0]
    kv = kv_ref[0]
    outs = []
    for h in range(n_heads):
        lo, hi = h * d_head, (h + 1) * d_head
        qh = q[:, lo:hi]                 # (tq,  Dh)
        kh = kv[:, lo:hi]                # (Lkv, Dh)
        vh = kv[:, D + lo:D + hi]        # (Lkv, Dh)
        # contract Dh of q with Dh of k -> (tq, Lkv); no in-kernel transpose.
        s = lax.dot_general(qh, kh, (((1,), (1,)), ((), ())),
                            preferred_element_type=jnp.float32)
        m = jnp.max(s, axis=-1, keepdims=True)
        p = jnp.exp(s - m)
        denom = jnp.sum(p, axis=-1, keepdims=True)
        oh = jnp.dot(p.astype(vh.dtype), vh,
                     preferred_element_type=jnp.float32)      # (tq, Dh)
        # defer normalization to the small (tq, Dh) result; EUP reciprocal.
        oh = oh * pl.reciprocal(denom, approx=True)
        outs.append(oh)
    o_ref[0] = jnp.concatenate(outs, axis=-1).astype(o_ref.dtype)


def multihead_attention(q, kv, n_heads):
    """q: (B, Lq, D), kv: (B, Lkv, 2*D) -> (B, Lq, D)."""
    B, Lq, D = q.shape
    _, Lkv, D2 = kv.shape
    d_head = D // n_heads
    tq = _pick_tile(Lq, 256, 8)
    kernel = functools.partial(_attn_kernel, n_heads=n_heads, d_head=d_head)
    itemsize = jnp.dtype(q.dtype).itemsize
    return pl.pallas_call(
        kernel,
        out_shape=jax.ShapeDtypeStruct((B, Lq, D), q.dtype),
        grid_spec=pltpu.PrefetchScalarGridSpec(
            num_scalar_prefetch=0,
            grid=(B, Lq // tq),
            in_specs=[
                pl.BlockSpec((1, tq, D), lambda b, i: (b, i, 0)),
                pl.BlockSpec((1, Lkv, D2), lambda b, i: (b, 0, 0)),
            ],
            out_specs=pl.BlockSpec((1, tq, D), lambda b, i: (b, i, 0)),
        ),
        compiler_params=pltpu.CompilerParams(
            dimension_semantics=("parallel", "parallel")),
        cost_estimate=pl.CostEstimate(
            flops=4 * B * n_heads * Lq * Lkv * d_head,
            transcendentals=B * n_heads * Lq * Lkv,
            bytes_accessed=itemsize * (2 * B * Lq * D + B * Lkv * D2)),
    )(q, kv)


# ----------------------------- Module wrapper ---------------------------------
def init_cross_attention_params(key, n_heads, d_embed, d_cross, dtype=jnp.float32):
    """Deterministic parameter init matching the PyTorch layer shapes.

    Weights stored as (d_in, d_out) (i.e. PyTorch weight.T) so kernels do x @ W."""
    ks = jax.random.split(key, 8)

    def u(k, shape, fan_in):
        bound = 1.0 / math.sqrt(fan_in)
        return jax.random.uniform(k, shape, dtype, -bound, bound)

    return {
        "wq": u(ks[0], (d_embed, d_embed), d_embed),
        "bq": u(ks[1], (d_embed,), d_embed),
        "wk": u(ks[2], (d_cross, d_embed), d_cross),
        "bk": u(ks[3], (d_embed,), d_cross),
        "wv": u(ks[4], (d_cross, d_embed), d_cross),
        "bv": u(ks[5], (d_embed,), d_cross),
        "wo": u(ks[6], (d_embed, d_embed), d_embed),
        "bo": u(ks[7], (d_embed,), d_embed),
    }


def cross_attention(params, x, y, n_heads):
    """x: (B, Lq, d_embed), y: (B, Lkv, d_cross) -> (B, Lq, d_embed)."""
    B, Lq, D = x.shape
    _, Lkv, Dc = y.shape
    d_head = D // n_heads
    scale = 1.0 / math.sqrt(d_head)

    # Fold 1/sqrt(d_head) into the Q projection (free, done on weights once).
    wq = params["wq"] * scale
    bq = params["bq"] * scale
    # Fuse K and V projections: they read the same y activations.
    w_kv = jnp.concatenate([params["wk"], params["wv"]], axis=1)   # (Dc, 2D)
    b_kv = jnp.concatenate([params["bk"], params["bv"]], axis=0)   # (2D,)

    q = linear(x.reshape(B * Lq, D), wq, bq).reshape(B, Lq, D)
    kv = linear(y.reshape(B * Lkv, Dc), w_kv, b_kv).reshape(B, Lkv, 2 * D)

    # Attention on (B, L, H*Dh) layout: no head transposes in HBM.
    o = multihead_attention(q, kv, n_heads)                         # (B, Lq, D)

    out = linear(o.reshape(B * Lq, D), params["wo"], params["bo"])
    return out.reshape(B, Lq, D)


# -------------------------- Pure-JAX reference --------------------------------
def cross_attention_ref(params, x, y, n_heads):
    B, Lq, D = x.shape
    _, Lkv, Dc = y.shape
    d_head = D // n_heads
    q = x @ params["wq"] + params["bq"]
    k = y @ params["wk"] + params["bk"]
    v = y @ params["wv"] + params["bv"]
    q = q.reshape(B, Lq, n_heads, d_head).transpose(0, 2, 1, 3)
    k = k.reshape(B, Lkv, n_heads, d_head).transpose(0, 2, 1, 3)
    v = v.reshape(B, Lkv, n_heads, d_head).transpose(0, 2, 1, 3)
    w = jnp.einsum("bhqd,bhkd->bhqk", q, k) / math.sqrt(d_head)
    w = jax.nn.softmax(w, axis=-1)
    o = jnp.einsum("bhqk,bhkd->bhqd", w, v)
    o = o.transpose(0, 2, 1, 3).reshape(B, Lq, D)
    return o @ params["wo"] + params["bo"]


if __name__ == "__main__":
    n_heads = 4
    d_embed = 32
    d_cross = 16
    B, Lq, Lkv = 2, 8, 8

    root = jax.random.PRNGKey(0)
    k_params, k_x, k_y = jax.random.split(root, 3)
    params = init_cross_attention_params(k_params, n_heads, d_embed, d_cross)
    x = jax.random.normal(k_x, (B, Lq, d_embed), dtype=jnp.float32)
    y = jax.random.normal(k_y, (B, Lkv, d_cross), dtype=jnp.float32)

    out = cross_attention(params, x, y, n_heads)
    out = jax.block_until_ready(out)

    ref = cross_attention_ref(params, x, y, n_heads)
    assert out.shape == (B, Lq, d_embed)
    # pl.reciprocal(approx=True) is an EUP approximation (~1e-4 relative),
    # so the tolerance is slightly looser than exact f32.
    assert jnp.allclose(out, ref, atol=2e-3, rtol=2e-3), "mismatch vs reference"

    print("KERNEL_OK")
</pallas_src>

<mosaic_0001>
module attributes {stable_mosaic.version = 11 : i64} {
  func.func @_linear_kernel(%arg0: i32, %arg1: i32, %arg2: i32, %arg3: memref<16x32xf32, #tpu.memory_space<vmem>>, %arg4: memref<32x32xf32, #tpu.memory_space<vmem>>, %arg5: memref<1x32xf32, #tpu.memory_space<vmem>>, %arg6: memref<16x32xf32, #tpu.memory_space<vmem>>, %arg7: memref<16x32xf32, #tpu.memory_space<vmem>>) attributes {dimension_semantics = [#tpu.dimension_semantics<parallel>, #tpu.dimension_semantics<parallel>, #tpu.dimension_semantics<arbitrary>], iteration_bounds = array<i64: 1, 1, 1>, scalar_prefetch = 0 : i64, scratch_operands = 1 : i64, tpu.core_type = #tpu.core_type<tc>, window_params = [{transform_indices = @transform_0, window_bounds = array<i64: 16, 32>}, {transform_indices = @transform_1, window_bounds = array<i64: 32, 32>}, {transform_indices = @transform_2, window_bounds = array<i64: 1, 32>}, {transform_indices = @transform_3, window_bounds = array<i64: 16, 32>}]} {
    %c0_i32 = arith.constant 0 : i32
    %0 = arith.cmpi eq, %arg2, %c0_i32 : i32
    %1 = arith.extui %0 : i1 to i32
    %c0_i32_0 = arith.constant 0 : i32
    %2 = arith.cmpi ne, %1, %c0_i32_0 : i32
    scf.if %2 {
      %cst_10 = arith.constant 0.000000e+00 : f32
      %12 = vector.broadcast %cst_10 : f32 to vector<16x32xf32>
      %c0_11 = arith.constant 0 : index
      %c0_12 = arith.constant 0 : index
      %13 = vector.load %arg7[%c0_11, %c0_12] : memref<16x32xf32, #tpu.memory_space<vmem>>, vector<16x32xf32>
      tpu.vector_store %arg7[%c0_11, %c0_12], %12 {strides = array<i32>} : memref<16x32xf32, #tpu.memory_space<vmem>>, vector<16x32xf32>,
    } else {
    }
    %c0 = arith.constant 0 : index
    %c0_1 = arith.constant 0 : index
    %3 = vector.load %arg7[%c0, %c0_1] : memref<16x32xf32, #tpu.memory_space<vmem>>, vector<16x32xf32>
    %c0_2 = arith.constant 0 : index
    %c0_3 = arith.constant 0 : index
    %4 = vector.load %arg3[%c0_2, %c0_3] : memref<16x32xf32, #tpu.memory_space<vmem>>, vector<16x32xf32>
    %c0_4 = arith.constant 0 : index
    %c0_5 = arith.constant 0 : index
    %5 = vector.load %arg4[%c0_4, %c0_5] : memref<32x32xf32, #tpu.memory_space<vmem>>, vector<32x32xf32>
    %cst = arith.constant dense<0.000000e+00> : vector<16x32xf32>
    %6 = tpu.matmul %4, %5, %cst {dimension_numbers = #tpu.dot_dimension_numbers<[1], [0], [0], [1], [0, 0, 1, 1], [], []>} : vector<16x32xf32>, vector<32x32xf32>, vector<16x32xf32> -> vector<16x32xf32>
    %7 = arith.addf %3, %6 : vector<16x32xf32>
    %c0_6 = arith.constant 0 : index
    %c0_7 = arith.constant 0 : index
    %8 = vector.load %arg7[%c0_6, %c0_7] : memref<16x32xf32, #tpu.memory_space<vmem>>, vector<16x32xf32>
    tpu.vector_store %arg7[%c0_6, %c0_7], %7 {strides = array<i32>} : memref<16x32xf32, #tpu.memory_space<vmem>>, vector<16x32xf32>,
    %c0_i32_8 = arith.constant 0 : i32
    %9 = arith.cmpi eq, %arg2, %c0_i32_8 : i32
    %10 = arith.extui %9 : i1 to i32
    %c0_i32_9 = arith.constant 0 : i32
    %11 = arith.cmpi ne, %10, %c0_i32_9 : i32
    scf.if %11 {
      %c0_10 = arith.constant 0 : index
      %c0_11 = arith.constant 0 : index
      %12 = vector.load %arg7[%c0_10, %c0_11] : memref<16x32xf32, #tpu.memory_space<vmem>>, vector<16x32xf32>
      %c0_12 = arith.constant 0 : index
      %c0_13 = arith.constant 0 : index
      %13 = vector.load %arg5[%c0_12, %c0_13] : memref<1x32xf32, #tpu.memory_space<vmem>>, vector<1x32xf32>
      %14 = vector.broadcast %13 : vector<1x32xf32> to vector<16x32xf32>
      %15 = arith.addf %12, %14 : vector<16x32xf32>
      %c0_14 = arith.constant 0 : index
      %c0_15 = arith.constant 0 : index
      %16 = vector.load %arg6[%c0_14, %c0_15] : memref<16x32xf32, #tpu.memory_space<vmem>>, vector<16x32xf32>
      tpu.vector_store %arg6[%c0_14, %c0_15], %15 {strides = array<i32>} : memref<16x32xf32, #tpu.memory_space<vmem>>, vector<16x32xf32>,
    } else {
    }
    return
  }
  func.func @transform_0(%arg0: i32, %arg1: i32, %arg2: i32) -> (i32, i32) {
    %c0_i32 = arith.constant 0 : i32
    return %arg0, %arg2 : i32, i32
  }
  func.func @transform_1(%arg0: i32, %arg1: i32, %arg2: i32) -> (i32, i32) {
    %c0_i32 = arith.constant 0 : i32
    return %arg2, %arg1 : i32, i32
  }
  func.func @transform_2(%arg0: i32, %arg1: i32, %arg2: i32) -> (i32, i32) {
    %c0_i32 = arith.constant 0 : i32
    %c0_i32_0 = arith.constant 0 : i32
    return %c0_i32, %arg1 : i32, i32
  }
  func.func @transform_3(%arg0: i32, %arg1: i32, %arg2: i32) -> (i32, i32) {
    %c0_i32 = arith.constant 0 : i32
    return %arg0, %arg1 : i32, i32
  }
}

</mosaic_0001>

<bundles_post_ra>
// kernel: tpu_custom_call.1
= control target key start
LH: loop header
LB: loop body
LE: loop exit
PB: predicated region body
PF: predicated region fallthrough
CT: control target
= control target key end

     0   :  { %8 = vsyncpa [#allocation4], 0  ;;  %s366_s0 = inlined_call_operand.hbm [shape: f32[16,32], index: 0, kind: input, shape index: {}]   ;;  %s367_s1 = inlined_call_operand.hbm [shape: f32[32,32], index: 1, kind: input, shape index: {}]   ;;  %s368_s2 = inlined_call_operand.vmem [shape: f32[1,32], index: 2, kind: input, shape index: {}]   ;;  %s369_s3 = inlined_call_operand.hbm [shape: f32[16,32], index: 3, kind: output, shape index: {}]  }
   0x1   :  { %9 = vsyncpa [#allocation7], 0 }
   0x2   :  { %10 = vsyncpa [#allocation5], 0  ;;  %s284_s12 = smov [#allocation3]   ;;  %s212_s16 = scalar_lea.hbm %s366_s0, 256 }
   0x3   :  { %s16_s13 = sshll.u32 %s284_s12, 4  ;;  %p213_p0 = scmp.ne.s32.totalorder %s366_s0, %s212_s16  ;;  %s17_s13 = int_to_ptr.vmem [resolvable:$true] %s16_s13 }
   0x4   :  { %p216_p1 = scmp.lt.u32.totalorder %s212_s16, %s366_s0 }
   0x6   :  { %p218_p2 = pnand %p216_p1, %p213_p0 }
   0x8   :  { %221 = shalt.err (!%p218_p2)
}
   0x9   :  { %s222_s21 = scalar_lea.vmem %s17_s13, 256  ;;  %p227_p4 = scmp.lt.s32.totalorder %s17_s13, %s17_s13 }
   0xa   :  { %p223_p3 = scmp.ne.s32.totalorder %s17_s13, %s222_s21  ;;  %p228_p5 = scmp.lt.s32.totalorder %s222_s21, %s222_s21 }
   0xc   :  { %p229_p6 = por %p228_p5, %p227_p4 }
   0xe   :  { %p230_p7 = pnand %p229_p6, %p223_p3 }
  0x10   :  { %233 = shalt.err (!%p230_p7)
}
  0x11   :  { %s285_s22 = smov 128   ;;  %s286_s23 = smov 8  }
  0x12   :  { %22 = dma.hbm_to_vmem [thread:$0]  %s366_s0, 256, %s17_s13, [#allocation4], %s285_s22, %s285_s22, %s286_s23  }
  0x13   :  { %s287_s26 = smov [#allocation6]   ;;  %s234_s30 = scalar_lea.hbm %s367_s1, 512 }
  0x14   :  { %s28_s27 = sshll.u32 %s287_s26, 4  ;;  %p235_p8 = scmp.ne.s32.totalorder %s367_s1, %s234_s30  ;;  %s29_s27 = int_to_ptr.vmem [resolvable:$true] %s28_s27 }
  0x15   :  { %p238_p9 = scmp.lt.u32.totalorder %s234_s30, %s367_s1 }
  0x17   :  { %p240_p10 = pnand %p238_p9, %p235_p8 }
  0x19   :  { %243 = shalt.err (!%p240_p10)
}
  0x1a   :  { %s244_s8 = scalar_lea.vmem %s29_s27, 512  ;;  %p249_p12 = scmp.lt.s32.totalorder %s29_s27, %s29_s27 }
  0x1b   :  { %p245_p11 = scmp.ne.s32.totalorder %s29_s27, %s244_s8  ;;  %p250_p13 = scmp.lt.s32.totalorder %s244_s8, %s244_s8 }
  0x1d   :  { %p251_p0 = por %p250_p13, %p249_p12 }
  0x1f   :  { %p252_p1 = pnand %p251_p0, %p245_p11 }
  0x21   :  { %255 = shalt.err (!%p252_p1)
}
  0x22   :  { %34 = dma.hbm_to_vmem [thread:$0]  %s367_s1, 512, %s29_s27, [#allocation7], %s285_s22, %s285_s22, %s286_s23  }
  0x23   :  { %278 = dma.done.wait [#allocation4], 256  }
  0x24   :  { %279 = vsyncadd [#allocation4], 4294967040 }
  0x25   :  { %280 = dma.done.wait [#allocation7], 512  }
  0x26   :  { %281 = vsyncadd [#allocation7], 4294966784  ;;  %vm47_vm0 = vcmask 261120   ;;  %v288_v0 = vmov 0.0   ;;  %v54_v1 = vld [vmem:[#allocation6] sm:$0xff]  ;;  %v55_v2 = vld [vmem:[#allocation6 + $0x8] sm:$0xff] }
  0x27   :  { %49 = vst.msk [vmem:[#allocation2 + $0x8] sm:$0xff] %vm47_vm0, %v288_v0  ;;  %48 = vst.msk [vmem:[#allocation2] sm:$0xff] %vm47_vm0, %v288_v0  ;;  %v56_v3 = vld [vmem:[#allocation6 + $0x10] sm:$0xff]  ;;  %v198_v4 = vpack.c.bf16 %v55_v2, %v54_v1  ;;  %v57_v5 = vld [vmem:[#allocation6 + $0x18] sm:$0xff]  ;;  %s289_s11 = smov [#allocation8]  }
  0x28   :  { %v52_v6 = vld [vmem:[#allocation3] sm:$0xff]  ;;  %v202_v7 = vpack.c.bf16 %v57_v5, %v56_v3  ;;  %v53_v8 = vld [vmem:[#allocation3 + $0x8] sm:$0xff]  ;;  %v180_v15 = vld [vmem:[%s368_s2] ss:$0 sm:$0xff]  ;;  %s165_s12 = sshll.u32 %s289_s11, 4  ;;  %s166_s12 = int_to_ptr.vmem [resolvable:$true] %s165_s12 }
  0x29   :  { %195 = vmatprep.mubr.msk.f32.mxu0 %vm47_vm0, %v52_v6  ;;  %199 = vmatprep.subr.bf16.mxu0 %v198_v4  ;;  %s256_s13 = scalar_lea.vmem %s166_s12, 256  ;;  %p261_p3 = scmp.lt.s32.totalorder %s166_s12, %s166_s12 }
  0x2a   :  { %201 = vmatpush3.bf16.msra.mxu0 %v198_v4  ;;  %p257_p2 = scmp.ne.s32.totalorder %s166_s12, %s256_s13  ;;  %p262_p4 = scmp.lt.s32.totalorder %s256_s13, %s256_s13 }
  0x2b   :  { %203 = vmatprep.subr.bf16.mxu0 %v202_v7 }
  0x2c   :  { %p263_p5 = por %p262_p4, %p261_p3 }
  0x2e   :  { %205 = vmatpush3.bf16.msra.mxu0 %v202_v7  ;;  %v51_v9 = vld [vmem:[#allocation2 + $0x8] sm:$0xff]  ;;  %v50_v10 = vld [vmem:[#allocation2] sm:$0xff]  ;;  %p264_p6 = pnand %p263_p5, %p257_p2 }
  0x31   :  { %196 = vmatmul.mubr.msk.f32.vlgmr.msra.gmra.mrb[0].mxu0 %vm47_vm0, %v53_v8 }
 0x104   :  { %v197_v11 = vpop.f32.mrb[0].mxu0 }
 0x105   :  { %v141_v12 = vadd.f32 %v197_v11, %v51_v9  ;;  %v131_v13 = vpop.f32.mrb[1].mxu0 }
 0x106   :  { %v140_v14 = vadd.f32 %v131_v13, %v50_v10 }
 0x107   :  { %143 = vst.msk [vmem:[#allocation2 + $0x8] sm:$0xff] %vm47_vm0, %v141_v12 }
 0x108   :  { %142 = vst.msk [vmem:[#allocation2] sm:$0xff] %vm47_vm0, %v140_v14 }
 0x10e   :  { %v148_v16 = vld [vmem:[#allocation2 + $0x8] sm:$0xff] }
 0x10f   :  { %v147_v17 = vld [vmem:[#allocation2] sm:$0xff]  ;;  %v157_v18 = vadd.f32 %v180_v15, %v148_v16 }
 0x110   :  { %v156_v19 = vadd.f32 %v180_v15, %v147_v17 }
 0x111   :  { %159 = vst.msk [vmem:[#allocation8 + $0x8] sm:$0xff] %vm47_vm0, %v157_v18 }
 0x112   :  { %158 = vst.msk [vmem:[#allocation8] sm:$0xff] %vm47_vm0, %v156_v19 }
 0x113   :  { %267 = shalt.err (!%p264_p6)
}
 0x114   :  { %s268_s15 = scalar_lea.hbm %s369_s3, 256 }
 0x115   :  { %p269_p7 = scmp.ne.s32.totalorder %s369_s3, %s268_s15  ;;  %p272_p8 = scmp.lt.u32.totalorder %s268_s15, %s369_s3 }
 0x117   :  { %p274_p9 = pnand %p272_p8, %p269_p7 }
 0x119   :  { %277 = shalt.err (!%p274_p9)
}
 0x11a   :  { %171 = dma.vmem_to_hbm [thread:$0]  %s166_s12, 256, %s369_s3, [#allocation5], %s285_s22, %s285_s22, %s286_s23  }
 0x11b   :  { %282 = dma.done.wait [#allocation5], 256  }
 0x11c   :  { %283 = vsyncadd [#allocation5], 4294967040 }
 0x11d   :  { %175 = vsyncpa [#allocation4], 1 }
 0x11e   :  { %176 = vsyncpa [#allocation7], 1 }
 0x11f   :  { %177 = vsyncpa [#allocation5], 1 }

</bundles_post_ra>
